<compile_context>
chip_gen: v5e
topology: v5e:2x2
jax: 0.10.0
libtpu: 0.0.40
codegen_flags: <defaults>
</compile_context>

<pallas_src>
import functools

import jax
import jax.numpy as jnp
import numpy as np
from jax.experimental import pallas as pl
from jax.experimental.pallas import tpu as pltpu

_MiB = 1024 * 1024


# --------------------------------------------------------------------------- #
# Hardware / budget helpers
# --------------------------------------------------------------------------- #
def _tpu_generation():
    try:
        kind = jax.devices()[0].device_kind.lower()
    except Exception:
        return "unknown"
    for tag in ("v7", "v6", "v5"):
        if tag in kind:
            return tag
    return "unknown"


def _vmem_capacity_bytes():
    try:
        return int(pltpu.get_tpu_info().vmem_capacity_bytes)
    except Exception:
        return 64 * _MiB  # conservative: assume the smallest (v7x) VMEM


def _vmem_plan():
    """Return (generation, vmem_limit_bytes, input-block byte budget)."""
    cap = _vmem_capacity_bytes()
    gen = _tpu_generation()
    if gen == "v7":    # 64 MiB physical, 3.2 TB/s HBM -> big tiles, tight cap
        limit = min(cap - 8 * _MiB, 56 * _MiB)
        in_budget = 12 * _MiB
    elif gen == "v6":  # 128 MiB physical, ~1.4 TB/s HBM
        limit = min((cap * 3) // 4, 96 * _MiB)
        in_budget = 12 * _MiB
    elif gen == "v5":  # 128 MiB physical, ~0.8 TB/s HBM -> moderate tiles
        limit = min(cap // 2, 32 * _MiB)
        in_budget = 6 * _MiB
    else:
        limit = min(cap // 2, 32 * _MiB)
        in_budget = 4 * _MiB
    return gen, max(int(limit), 16 * _MiB), int(in_budget)


def _pool_dtype(mxu_dtype, gen):
    # bf16 VALU exists on v6e/v7x; v5e keeps pooling math in f32.
    if np.dtype(mxu_dtype) == np.dtype(np.float32):
        return jnp.float32
    return jnp.bfloat16 if gen in ("v6", "v7") else jnp.float32


def _choose_tile_rows(H, Wo, Cin, Cout_pad, *, x_itemsize, out_itemsize,
                      w_itemsize, pool_itemsize, in_budget, vmem_limit,
                      max_rows):
    """Largest even row-tile whose TOTAL per-step VMEM footprint fits.

    Footprint model: 2x double-buffered input block + f32 BN/ReLU intermediate
    + pooled intermediate + 2x double-buffered output block + (double-buffer
    allocated) resident weight + scale/shift.
    """
    C2 = 2 * Cin
    weight_bytes = 2 * Cin * Cout_pad * w_itemsize
    small_bytes = 4 * C2 * 4

    def fits(t_h):
        in_blk = t_h * Wo * C2 * x_itemsize
        if in_blk > in_budget:
            return False
        interm = t_h * Wo * C2 * 4 + 2 * (t_h // 2) * Wo * Cin * pool_itemsize
        out_blk = (t_h // 2) * Wo * Cout_pad * out_itemsize
        total = 2 * in_blk + interm + 2 * out_blk + weight_bytes + small_bytes
        return total <= (vmem_limit * 4) // 5  # 20% headroom

    hi = max(2, max_rows - (max_rows % 2))
    t_cap = 2
    for t in range(hi, 1, -2):
        if fits(t):
            t_cap = t
            break
    # Prefer an even divisor of H (no row padding) unless it is much smaller
    # than the cap (avoids the old t_h=2 degenerate fallback for awkward H).
    for t in range(t_cap, 1, -2):
        if H % t == 0:
            if 2 * t >= t_cap:
                return t
            break
    return t_cap  # ragged: caller pads H up to a multiple of t_cap


# --------------------------------------------------------------------------- #
# Kernel
# --------------------------------------------------------------------------- #
def _transition_kernel(x_ref, scale_ref, shift_ref, w_ref, o_ref, *, pool_dtype):
    # x_ref:     (t_h, W/2, 2*Cin)  rows x pooled-cols x [even-w chans | odd-w chans]
    # scale_ref: (1, 2*Cin)         folded BN scale (tiled for both w-parities)
    # shift_ref: (1, 2*Cin)         folded BN shift
    # w_ref:     (Cin, Cout_pad)    1x1 conv weight * 0.25, lane-padded, MXU dtype
    # o_ref:     (t_h//2, W/2, Cout_pad)
    Ho, Wo, Cout = o_ref.shape
    C2 = x_ref.shape[-1]
    Cin = C2 // 2

    # Eval-mode BN (folded) + ReLU in f32 on the VPU, then drop to the pool
    # dtype (bf16 on v6e/v7x, f32 on v5e).
    h = jnp.maximum(
        x_ref[...].astype(jnp.float32) * scale_ref[...].reshape(1, 1, C2)
        + shift_ref[...].reshape(1, 1, C2),
        0.0,
    ).astype(pool_dtype)

    # 2x2 / stride-2 average pool on the VPU (the 1/4 lives in the weight).
    h = h.reshape(Ho, 2, Wo, C2)              # split leading dim only (free)
    h = h[:, 0] + h[:, 1]                     # pool adjacent rows
    h = h[:, :, :Cin] + h[:, :, Cin:]         # pool adjacent columns (lane slice)

    # 1x1 conv as one (Ho*Wo, Cin) @ (Cin, Cout_pad) MXU matmul, f32 accumulation.
    lhs = h.reshape(Ho * Wo, Cin).astype(w_ref.dtype)
    y = jnp.dot(lhs, w_ref[...], preferred_element_type=jnp.float32)
    o_ref[...] = y.reshape(Ho, Wo, Cout).astype(o_ref.dtype)


def _transition_nhwc_pallas(x_nhwc, scale, shift, w_pad, mxu_dtype):
    """Core Pallas call. x_nhwc: (N, H, W, Cin) -> (N, H/2, W/2, Cout_pad)."""
    N, H, W, Cin = x_nhwc.shape
    Cout_pad = w_pad.shape[1]
    Wo = W // 2
    Ho_all = H // 2

    gen, vmem_limit, in_budget = _vmem_plan()
    pool_dt = _pool_dtype(mxu_dtype, gen)

    # v7x megacore balance: with a single image keep >= 2 grid steps.
    max_rows = H
    if gen == "v7" and N == 1 and H >= 4:
        max_rows = H // 2

    t_h = _choose_tile_rows(
        H, Wo, Cin, Cout_pad,
        x_itemsize=x_nhwc.dtype.itemsize,
        out_itemsize=x_nhwc.dtype.itemsize,
        w_itemsize=np.dtype(mxu_dtype).itemsize,
        pool_itemsize=np.dtype(pool_dt).itemsize,
        in_budget=in_budget, vmem_limit=vmem_limit, max_rows=max_rows)
    Ho = t_h // 2

    # Free row-major reinterpretation: (N,H,W,C) -> (N,H,W/2,2C); last axis is
    # laid out as [even-w channels | odd-w channels].
    x2 = x_nhwc.reshape(N, H, Wo, 2 * Cin)

    # Ragged H: pad rows up to a multiple of the tile (pad rows only produce
    # extra output rows, which are sliced off below; they never mix with real
    # rows because the pad amount is even).
    H_run = ((H + t_h - 1) // t_h) * t_h
    if H_run != H:
        x2 = jnp.pad(x2, ((0, 0), (0, H_run - H), (0, 0), (0, 0)))
    grid = (N, H_run // t_h)

    scale2 = jnp.tile(scale.reshape(1, Cin), (1, 2)).astype(jnp.float32)
    shift2 = jnp.tile(shift.reshape(1, Cin), (1, 2)).astype(jnp.float32)

    flops = 2 * N * (H_run // 2) * Wo * Cin * Cout_pad + 5 * N * H_run * W * Cin
    bytes_accessed = (
        N * H_run * W * Cin * x_nhwc.dtype.itemsize
        + w_pad.size * w_pad.dtype.itemsize
        + 4 * Cin * 4
        + N * (H_run // 2) * Wo * Cout_pad * x_nhwc.dtype.itemsize)

    kernel = functools.partial(_transition_kernel, pool_dtype=pool_dt)

    out = pl.pallas_call(
        kernel,
        out_shape=jax.ShapeDtypeStruct((N, H_run // 2, Wo, Cout_pad), x_nhwc.dtype),
        grid=grid,
        in_specs=[
            pl.BlockSpec((pl.Squeezed(), t_h, Wo, 2 * Cin), lambda n, i: (n, i, 0, 0)),
            pl.BlockSpec((1, 2 * Cin), lambda n, i: (0, 0)),
            pl.BlockSpec((1, 2 * Cin), lambda n, i: (0, 0)),
            # Constant index_map -> fetched once, resident across the grid.
            pl.BlockSpec((Cin, Cout_pad), lambda n, i: (0, 0)),
        ],
        out_specs=pl.BlockSpec(
            (pl.Squeezed(), Ho, Wo, Cout_pad), lambda n, i: (n, i, 0, 0)),
        compiler_params=pltpu.CompilerParams(
            dimension_semantics=("parallel", "parallel"),
            vmem_limit_bytes=int(vmem_limit)),
        cost_estimate=pl.CostEstimate(
            flops=flops, transcendentals=0, bytes_accessed=bytes_accessed),
    )(x2, scale2, shift2, w_pad)

    if H_run != H:
        out = out[:, :Ho_all]
    return out


# --------------------------------------------------------------------------- #
# Parameter prep + public entry points
# --------------------------------------------------------------------------- #
def _fold_bn(gamma, beta, run_mean, run_var, eps):
    inv = gamma * jax.lax.rsqrt(run_var + eps)
    return inv, beta - run_mean * inv


def _prep_weight(conv_w, mxu_dtype):
    # torch weight (Cout, Cin[, 1, 1]) -> (Cin, Cout_pad); the 2x2 avg-pool
    # normalisation (1/4) is folded in here (in f32, before any low-precision
    # cast).  Cout is zero-padded to a lane-dense multiple of 128.
    if conv_w.ndim == 4:
        conv_w = conv_w[:, :, 0, 0]
    Cout, Cin = conv_w.shape
    Cout_pad = ((Cout + 127) // 128) * 128
    w = (jnp.transpose(conv_w, (1, 0)).astype(jnp.float32) * 0.25).astype(mxu_dtype)
    if Cout_pad != Cout:
        w = jnp.pad(w, ((0, 0), (0, Cout_pad - Cout)))
    return w, Cout


@functools.partial(jax.jit, static_argnames=("eps", "mxu_dtype"))
def transition_forward_nhwc(x_nhwc, gamma, beta, run_mean, run_var, conv_w,
                            eps=1e-5, mxu_dtype=jnp.bfloat16):
    """Channels-last Transition forward: (N, H, W, Cin) -> (N, H/2, W/2, Cout)."""
    N, H, W, Cin = x_nhwc.shape
    if H % 2 or W % 2:
        raise ValueError(f"AvgPool2d(2,2) requires even H and W; got H={H}, W={W}")
    scale, shift = _fold_bn(gamma, beta, run_mean, run_var, eps)
    w_pad, Cout = _prep_weight(conv_w, mxu_dtype)
    out = _transition_nhwc_pallas(x_nhwc, scale, shift, w_pad, mxu_dtype)
    # NOTE: consumers that can take padded channels should use the padded
    # output directly and skip this extra read+write of the output tensor.
    return out[..., :Cout]


@functools.partial(jax.jit, static_argnames=("eps", "mxu_dtype"))
def transition_forward(x_nchw, gamma, beta, run_mean, run_var, conv_w,
                       eps=1e-5, mxu_dtype=jnp.bfloat16):
    """PyTorch-parity NCHW wrapper: (N, Cin, H, W) -> (N, Cout, H/2, W/2).

    The NCHW<->NHWC transposes are full extra HBM passes kept only for parity;
    prefer transition_forward_nhwc in a channels-last (optionally bf16) pipeline.
    """
    x = jnp.transpose(x_nchw, (0, 2, 3, 1))
    out = transition_forward_nhwc(x, gamma, beta, run_mean, run_var, conv_w,
                                  eps=eps, mxu_dtype=mxu_dtype)
    return jnp.transpose(out, (0, 3, 1, 2))


def _reference_forward(x, gamma, beta, run_mean, run_var, conv_w, eps=1e-5):
    # Pure-JAX reference matching PyTorch eval-mode semantics (NCHW).
    m = run_mean[None, :, None, None]
    v = run_var[None, :, None, None]
    g = gamma[None, :, None, None]
    b = beta[None, :, None, None]
    h = jnp.maximum((x - m) / jnp.sqrt(v + eps) * g + b, 0.0)
    y = jnp.einsum("nchw,oc->nohw", h, conv_w)
    N, Co, H, W = y.shape
    return y.reshape(N, Co, H // 2, 2, W // 2, 2).mean(axis=(3, 5))


if __name__ == "__main__":
    N, Cin, H, W = 2, 4, 16, 16
    Cout = 8

    key = jax.random.PRNGKey(0)
    kx, kg, kb, km, kv, kw = jax.random.split(key, 6)

    x = jax.random.normal(kx, (N, Cin, H, W), dtype=jnp.float32)
    gamma = jax.random.normal(kg, (Cin,), dtype=jnp.float32) * 0.1 + 1.0
    beta = jax.random.normal(kb, (Cin,), dtype=jnp.float32) * 0.1
    run_mean = jax.random.normal(km, (Cin,), dtype=jnp.float32) * 0.1
    run_var = jax.random.uniform(kv, (Cin,), dtype=jnp.float32, minval=0.5, maxval=1.5)
    conv_w = jax.random.normal(kw, (Cout, Cin), dtype=jnp.float32) * (1.0 / np.sqrt(Cin))

    ref = _reference_forward(x, gamma, beta, run_mean, run_var, conv_w)

    # Exact (f32 MXU, f32 pooling) path: tight tolerance.
    out_f32 = jax.block_until_ready(
        transition_forward(x, gamma, beta, run_mean, run_var, conv_w,
                           mxu_dtype=jnp.float32))
    assert out_f32.shape == (N, Cout, H // 2, W // 2), out_f32.shape
    np.testing.assert_allclose(np.asarray(out_f32), np.asarray(ref),
                               rtol=1e-4, atol=1e-5)

    # Production path (bf16 MXU operands, bf16 pooling on v6e/v7x, f32 acc).
    out_bf16 = jax.block_until_ready(
        transition_forward(x, gamma, beta, run_mean, run_var, conv_w))
    assert out_bf16.shape == (N, Cout, H // 2, W // 2), out_bf16.shape
    np.testing.assert_allclose(np.asarray(out_bf16), np.asarray(ref),
                               rtol=3e-2, atol=3e-2)

    # Preferred channels-last entry point (no NCHW transpose passes).
    x_nhwc = jnp.transpose(x, (0, 2, 3, 1))
    out_nhwc = jax.block_until_ready(
        transition_forward_nhwc(x_nhwc, gamma, beta, run_mean, run_var, conv_w))
    assert out_nhwc.shape == (N, H // 2, W // 2, Cout), out_nhwc.shape
    np.testing.assert_allclose(np.asarray(jnp.transpose(out_nhwc, (0, 3, 1, 2))),
                               np.asarray(ref), rtol=3e-2, atol=3e-2)

    print("KERNEL_OK")
</pallas_src>

<mosaic_0001>
module attributes {stable_mosaic.version = 11 : i64} {
  func.func @_transition_kernel(%arg0: i32, %arg1: i32, %arg2: memref<1x16x8x8xf32, #tpu.memory_space<vmem>>, %arg3: memref<1x8xf32, #tpu.memory_space<vmem>>, %arg4: memref<1x8xf32, #tpu.memory_space<vmem>>, %arg5: memref<4x128xf32, #tpu.memory_space<vmem>>, %arg6: memref<1x8x8x128xf32, #tpu.memory_space<vmem>>) attributes {dimension_semantics = [#tpu.dimension_semantics<parallel>, #tpu.dimension_semantics<parallel>], iteration_bounds = array<i64: 2, 1>, scalar_prefetch = 0 : i64, scratch_operands = 0 : i64, tpu.core_type = #tpu.core_type<tc>, window_params = [{transform_indices = @transform_0, window_bounds = array<i64: 1, 16, 8, 8>}, {pipeline_mode = #tpu.pipeline_mode<synchronous>, transform_indices = @transform_1, window_bounds = array<i64: 1, 8>}, {pipeline_mode = #tpu.pipeline_mode<synchronous>, transform_indices = @transform_2, window_bounds = array<i64: 1, 8>}, {pipeline_mode = #tpu.pipeline_mode<synchronous>, transform_indices = @transform_3, window_bounds = array<i64: 4, 128>}, {transform_indices = @transform_4, window_bounds = array<i64: 1, 8, 8, 128>}]} {
    %c0 = arith.constant 0 : index
    %c0_0 = arith.constant 0 : index
    %c0_1 = arith.constant 0 : index
    %c0_2 = arith.constant 0 : index
    %0 = vector.load %arg2[%c0, %c0_0, %c0_1, %c0_2] : memref<1x16x8x8xf32, #tpu.memory_space<vmem>>, vector<1x16x8x8xf32>
    %1 = vector.shape_cast %0 : vector<1x16x8x8xf32> to vector<16x8x8xf32>
    %c0_3 = arith.constant 0 : index
    %c0_4 = arith.constant 0 : index
    %2 = vector.load %arg3[%c0_3, %c0_4] : memref<1x8xf32, #tpu.memory_space<vmem>>, vector<1x8xf32>
    %3 = vector.shape_cast %2 : vector<1x8xf32> to vector<1x1x8xf32>
    %4 = vector.broadcast %3 : vector<1x1x8xf32> to vector<16x8x8xf32>
    %5 = arith.mulf %1, %4 : vector<16x8x8xf32>
    %c0_5 = arith.constant 0 : index
    %c0_6 = arith.constant 0 : index
    %6 = vector.load %arg4[%c0_5, %c0_6] : memref<1x8xf32, #tpu.memory_space<vmem>>, vector<1x8xf32>
    %7 = vector.shape_cast %6 : vector<1x8xf32> to vector<1x1x8xf32>
    %8 = vector.broadcast %7 : vector<1x1x8xf32> to vector<16x8x8xf32>
    %9 = arith.addf %5, %8 : vector<16x8x8xf32>
    %cst = arith.constant 0.000000e+00 : f32
    %10 = vector.broadcast %cst : f32 to vector<16x8x8xf32>
    %11 = arith.maximumf %9, %10 : vector<16x8x8xf32>
    %12 = vector.shape_cast %11 : vector<16x8x8xf32> to vector<8x2x8x8xf32>
    %13 = vector.extract_strided_slice %12 {offsets = [0, 0, 0, 0], sizes = [8, 1, 8, 8], strides = [1, 1, 1, 1]} : vector<8x2x8x8xf32> to vector<8x1x8x8xf32>
    %14 = vector.shape_cast %13 : vector<8x1x8x8xf32> to vector<8x8x8xf32>
    %15 = vector.extract_strided_slice %12 {offsets = [0, 1, 0, 0], sizes = [8, 1, 8, 8], strides = [1, 1, 1, 1]} : vector<8x2x8x8xf32> to vector<8x1x8x8xf32>
    %16 = vector.shape_cast %15 : vector<8x1x8x8xf32> to vector<8x8x8xf32>
    %17 = arith.addf %14, %16 : vector<8x8x8xf32>
    %18 = vector.extract_strided_slice %17 {offsets = [0, 0, 0], sizes = [8, 8, 4], strides = [1, 1, 1]} : vector<8x8x8xf32> to vector<8x8x4xf32>
    %19 = vector.extract_strided_slice %17 {offsets = [0, 0, 4], sizes = [8, 8, 4], strides = [1, 1, 1]} : vector<8x8x8xf32> to vector<8x8x4xf32>
    %20 = arith.addf %18, %19 : vector<8x8x4xf32>
    %21 = vector.shape_cast %20 : vector<8x8x4xf32> to vector<64x4xf32>
    %c0_7 = arith.constant 0 : index
    %c0_8 = arith.constant 0 : index
    %22 = vector.load %arg5[%c0_7, %c0_8] : memref<4x128xf32, #tpu.memory_space<vmem>>, vector<4x128xf32>
    %cst_9 = arith.constant dense<0.000000e+00> : vector<64x128xf32>
    %23 = tpu.matmul %21, %22, %cst_9 {dimension_numbers = #tpu.dot_dimension_numbers<[1], [0], [0], [1], [0, 0, 1, 1], [], []>} : vector<64x4xf32>, vector<4x128xf32>, vector<64x128xf32> -> vector<64x128xf32>
    %24 = vector.shape_cast %23 : vector<64x128xf32> to vector<8x8x128xf32>
    %c0_10 = arith.constant 0 : index
    %c0_11 = arith.constant 0 : index
    %c0_12 = arith.constant 0 : index
    %c0_13 = arith.constant 0 : index
    %25 = vector.load %arg6[%c0_10, %c0_11, %c0_12, %c0_13] : memref<1x8x8x128xf32, #tpu.memory_space<vmem>>, vector<1x8x8x128xf32>
    %26 = vector.shape_cast %25 : vector<1x8x8x128xf32> to vector<8x8x128xf32>
    %27 = vector.shape_cast %24 : vector<8x8x128xf32> to vector<1x8x8x128xf32>
    tpu.vector_store %arg6[%c0_10, %c0_11, %c0_12, %c0_13], %27 {strides = array<i32>} : memref<1x8x8x128xf32, #tpu.memory_space<vmem>>, vector<1x8x8x128xf32>,
    return
  }
  func.func @transform_0(%arg0: i32, %arg1: i32) -> (i32, i32, i32, i32) {
    %c0_i32 = arith.constant 0 : i32
    %c0_i32_0 = arith.constant 0 : i32
    %c0_i32_1 = arith.constant 0 : i32
    return %arg0, %arg1, %c0_i32, %c0_i32_0 : i32, i32, i32, i32
  }
  func.func @transform_1(%arg0: i32, %arg1: i32) -> (i32, i32) {
    %c0_i32 = arith.constant 0 : i32
    %c0_i32_0 = arith.constant 0 : i32
    %c0_i32_1 = arith.constant 0 : i32
    return %c0_i32, %c0_i32_0 : i32, i32
  }
  func.func @transform_2(%arg0: i32, %arg1: i32) -> (i32, i32) {
    %c0_i32 = arith.constant 0 : i32
    %c0_i32_0 = arith.constant 0 : i32
    %c0_i32_1 = arith.constant 0 : i32
    return %c0_i32, %c0_i32_0 : i32, i32
  }
  func.func @transform_3(%arg0: i32, %arg1: i32) -> (i32, i32) {
    %c0_i32 = arith.constant 0 : i32
    %c0_i32_0 = arith.constant 0 : i32
    %c0_i32_1 = arith.constant 0 : i32
    return %c0_i32, %c0_i32_0 : i32, i32
  }
  func.func @transform_4(%arg0: i32, %arg1: i32) -> (i32, i32, i32, i32) {
    %c0_i32 = arith.constant 0 : i32
    %c0_i32_0 = arith.constant 0 : i32
    %c0_i32_1 = arith.constant 0 : i32
    return %arg0, %arg1, %c0_i32, %c0_i32_0 : i32, i32, i32, i32
  }
}

</mosaic_0001>

<bundles_post_ra>
// kernel: transition_forward_nhwc.1
= control target key start
LH: loop header
LB: loop body
LE: loop exit
PB: predicated region body
PF: predicated region fallthrough
CT: control target
= control target key end

     0   :  { %9 = vsyncpa [#allocation3], 0  ;;  %s876_s0 = inlined_call_operand.vmem [shape: f32[2,16,8,8], index: 0, kind: input, shape index: {}]   ;;  %s877_s1 = inlined_call_operand.vmem [shape: f32[1,8], index: 1, kind: input, shape index: {}]   ;;  %s878_s2 = inlined_call_operand.vmem [shape: f32[1,8], index: 2, kind: input, shape index: {}]   ;;  %s879_s3 = inlined_call_operand.vmem [shape: f32[4,128], index: 3, kind: input, shape index: {}]   ;;  %s880_s4 = inlined_call_operand.hbm [shape: f32[2,8,8,128], index: 4, kind: output, shape index: {}]  }
   0x1   :  { %11 = vsyncpa [#allocation3 + $0x1], 0  ;;  %s718_s15 = smov 0   ;;  %s720_s16 = smov 0  }
   0x2   :  { %s722_s17 = smov 0   ;;  %s724_s18 = smov 0  }
   0x3   :  { %s726_s19 = smov 0   ;;  %s728_s20 = smov 0  }
   0x4 LB: > { %s523_s21 = sadd.s32 4294967295, %s688_s20   ;;  %s524_s22 = sadd.s32 4294967294, %s688_s20   ;;  %s688_s20 = sphi %s728_s20, %s17_s20   ;;  %s684_s19 = sphi %s726_s19, %s887_s19   ;;  %s680_s18 = sphi %s724_s18, %s886_s18   ;;  %s676_s17 = sphi %s722_s17, %s885_s17   ;;  %s672_s16 = sphi %s720_s16, %s884_s16   ;;  %s668_s15 = sphi %s718_s15, %s883_s15  }
   0x5   : > { %s29_s23 = sadd.s32 1, %s684_s19  ;;  %s129_s24 = sadd.s32 1, %s676_s17 }
   0x6   : > { %p31_p0 = scmp.ge.s32.totalorder %s29_s23, 2  ;;  %p139_p1 = scmp.ne.s32.totalorder %s676_s17, %s672_s16 }
   0x7   : > { %p140_p2 = scmp.eq.s32.totalorder %s523_s21, 1  ;;  %p145_p3 = scmp.ne.s32.totalorder %s672_s16, %s668_s15 }
   0x8   : > { %s889_s23 = smov (%p31_p0, %s29_s23), 0  ;;  %p146_p5 = scmp.eq.s32.totalorder %s524_s22, 1 }
   0x9   : > { %p758_p4 = por %p140_p2, %p139_p1  ;;  %s124_s26 = ssub.s32 %s684_s19, %s889_s23 }
   0xa   : > { %p527_p6 = scmp.ge.s32.totalorder %s688_s20, 1  ;;  %p127_p7 = scmp.eq.s32.totalorder %s124_s26, 0 }
   0xb   : > { %p765_p8 = por %p146_p5, %p145_p3  ;;  %p186_p9 = scmp.lt.s32.totalorder %s688_s20, 3 }
   0xc   : > { %s771_s28 = scalar_select %p127_p7, %s676_s17, %s129_s24  }
   0xd   : > { %p187_p10 = pnand %p527_p6, %p186_p9 }
   0xe   : > { %p217_p11 = scmp.lt.s32.totalorder (!%p187_p10), %s680_s18, 1  ;;  %s690_s12 = smov (!%p187_p10), 124  }
   0xf   : > { %190 = sbr.rel (%p187_p10) target bundleno = 302 (0x12e), region = 36  ;;  %s213_s21 = sand.u32 (!%p187_p10), 1, %s672_s16  }
  0x10   : > { %s528_s22 = sshll.u32 (!%p187_p10), %s213_s21, 6  ;;  %s546_s26 = sshll.u32 (!%p187_p10), %s680_s18, 6 }
  0x11   : > { %s215_s24 = scalar_lea.vmem (!%p187_p10), [#allocation2], %s528_s22  ;;  %s440_s5 = scalar_lea.hbm (!%p187_p10), %s880_s4, %s546_s26 }
  0x12   : > { %s443_s7 = sshll.u32 (!%p187_p10), %s440_s5, 4  ;;  %s444_s7 = int_to_ptr.hbm [resolvable:$true] %s443_s7 }
  0x13   : > { %s624_s8 = sshra.s32 (!%p187_p10), %s444_s7, 4  ;;  %s625_s8 = int_to_ptr.hbm [resolvable:$true] %s624_s8 }
  0x14   : > { %s218_s29 = scalar_select %p217_p11, %s680_s18, 1  ;;  %v608_v0 = vld [vmem:[%s877_s1] ss:$0 sm:$0xff]  ;;  %vm373_vm0 = vcmask 1043456   ;;  %vm348_vm1 = vcmask 31744  }
  0x15   : > { %v786_v1 = vld [vmem:[%s878_s2] ss:$0 sm:$0xff]  ;;  %s427_s18 = scalar_lea.sflag [#allocation3], %s213_s21  ;;  %p631_p1 = scmp.lt.s32.totalorder %s625_s8, %s880_s4 }
  0x16   : > { %s545_s6 = sshll.u32 %s218_s29, 7 }
  0x17   : > { %s781_s9 = scalar_lea.vmem %s876_s0, %s545_s6  ;;  %s441_s6 = sshll.u32 %s215_s24, 4  ;;  %s442_s6 = int_to_ptr.vmem [resolvable:$true] %s441_s6 }
  0x18   : > { %v235_v2 = vld [vmem:[%s781_s9 + $0x40] sm:$0xff]  ;;  %v236_v3 = vld [vmem:[%s781_s9 + $0x48] sm:$0xff]  ;;  %v229_v28 = vld [vmem:[%s781_s9 + $0x10] sm:$0xff] }
  0x19   : > { %v227_v4 = vld [vmem:[%s781_s9] sm:$0xff]  ;;  %v255_v5 = vmul.f32 %v608_v0, %v235_v2  ;;  %v256_v6 = vmul.f32 %v608_v0, %v236_v3  ;;  %v228_v7 = vld [vmem:[%s781_s9 + $0x8] sm:$0xff]  ;;  %v230_v31 = vld [vmem:[%s781_s9 + $0x18] sm:$0xff]  ;;  %v249_v42 = vmul.f32 %v608_v0, %v229_v28 }
  0x1a   : > { %v247_v8 = vmul.f32 %v608_v0, %v227_v4  ;;  %v239_v9 = vld [vmem:[%s781_s9 + $0x60] sm:$0xff]  ;;  %v240_v10 = vld [vmem:[%s781_s9 + $0x68] sm:$0xff]  ;;  %v248_v11 = vmul.f32 %v608_v0, %v228_v7  ;;  %v233_v32 = vld [vmem:[%s781_s9 + $0x30] sm:$0xff]  ;;  %v250_v44 = vmul.f32 %v608_v0, %v230_v31 }
  0x1b   : > { %v259_v12 = vmul.f32 %v608_v0, %v239_v9  ;;  %v260_v13 = vmul.f32 %v608_v0, %v240_v10  ;;  %v231_v14 = vld [vmem:[%s781_s9 + $0x20] sm:$0xff]  ;;  %v232_v15 = vld [vmem:[%s781_s9 + $0x28] sm:$0xff]  ;;  %v275_v16 = vadd.f32 %v786_v1, %v255_v5  ;;  %v276_v17 = vadd.f32 %v786_v1, %v256_v6  ;;  %v237_v33 = vld [vmem:[%s781_s9 + $0x50] sm:$0xff] }
  0x1c   : > { %v267_v18 = vadd.f32 %v786_v1, %v247_v8  ;;  %v251_v19 = vmul.f32 %v608_v0, %v231_v14  ;;  %v268_v20 = vadd.f32 %v786_v1, %v248_v11  ;;  %v252_v23 = vmul.f32 %v608_v0, %v232_v15  ;;  %v234_v36 = vld [vmem:[%s781_s9 + $0x38] sm:$0xff]  ;;  %v241_v38 = vld [vmem:[%s781_s9 + $0x70] sm:$0xff] }
  0x1d   : > { %v279_v21 = vadd.f32 %v786_v1, %v259_v12  ;;  %v280_v22 = vadd.f32 %v786_v1, %v260_v13  ;;  %v291_v24 = vmax.f32 %v275_v16, 0.0  ;;  %v292_v25 = vmax.f32 %v276_v17, 0.0  ;;  %v238_v37 = vld [vmem:[%s781_s9 + $0x58] sm:$0xff] }
  0x1e   : > { %v283_v26 = vmax.f32 %v267_v18, 0.0  ;;  %v271_v27 = vadd.f32 %v786_v1, %v251_v19  ;;  %v284_v29 = vmax.f32 %v268_v20, 0.0  ;;  %v272_v30 = vadd.f32 %v786_v1, %v252_v23  ;;  %v242_v47 = vld [vmem:[%s781_s9 + $0x78] sm:$0xff]  ;;  %s626_s9 = scalar_lea.hbm %s625_s8, 64 }
  0x1f   : > { %v303_v34 = vadd.f32 %v292_v25, %v291_v24  ;;  %v295_v35 = vmax.f32 %v279_v21, 0.0  ;;  %v296_v40 = vmax.f32 %v280_v22, 0.0  ;;  %v253_v45 = vmul.f32 %v608_v0, %v233_v32  ;;  %p627_p12 = scmp.ne.s32.totalorder %s625_s8, %s626_s9 }
  0x20   : > { %v299_v39 = vadd.f32 %v284_v29, %v283_v26  ;;  %v287_v41 = vmax.f32 %v271_v27, 0.0  ;;  %v288_v43 = vmax.f32 %v272_v30, 0.0  ;;  %v257_v46 = vmul.f32 %v608_v0, %v237_v33 }
  0x21   : > { %323 = vrot.lane.b32.xlu0 %v303_v34, %s690_s12  ;;  %v254_v48 = vmul.f32 %v608_v0, %v234_v36  ;;  %v258_v49 = vmul.f32 %v608_v0, %v238_v37  ;;  %v261_v50 = vmul.f32 %v608_v0, %v241_v38  ;;  %v305_v52 = vadd.f32 %v296_v40, %v295_v35  ;;  %p628_p13 = pnand %p627_p12, %p758_p4 }
  0x22   : > { %315 = vrot.lane.b32.xlu1 %v299_v39, %s690_s12  ;;  %v277_v51 = vadd.f32 %v786_v1, %v257_v46  ;;  %v269_v53 = vadd.f32 %v786_v1, %v249_v42  ;;  %v262_v55 = vmul.f32 %v608_v0, %v242_v47  ;;  %v301_v56 = vadd.f32 %v288_v43, %v287_v41 }
  0x23   : > { %v278_v54 = vadd.f32 %v786_v1, %v258_v49  ;;  %v270_v57 = vadd.f32 %v786_v1, %v250_v44  ;;  %v273_v58 = vadd.f32 %v786_v1, %v253_v45  ;;  %v274_v60 = vadd.f32 %v786_v1, %v254_v48  ;;  %p629_p0 = pneg %p628_p13 }
  0x24   : > { %v293_v59 = vmax.f32 %v277_v51, 0.0  ;;  %v281_v62 = vadd.f32 %v786_v1, %v261_v50  ;;  %v282_v63 = vadd.f32 %v786_v1, %v262_v55  ;;  %v285_v3 = vmax.f32 %v269_v53, 0.0  ;;  %v347_v1 = vld [vmem:[%s879_s3] sm:$0xf] }
  0x25   : > { %v294_v61 = vmax.f32 %v278_v54, 0.0  ;;  %v286_v4 = vmax.f32 %v270_v57, 0.0  ;;  %v289_v0 = vmax.f32 %v273_v58, 0.0  ;;  %v290_v5 = vmax.f32 %v274_v60, 0.0  ;;  %548 = vmatpush.msk.msra.mxu2 %vm373_vm0, %v347_v1  ;;  %531 = vmatpush.msk.msra.mxu0 %vm373_vm0, %v347_v1 }
  0x26   : > { %v297_v6 = vmax.f32 %v281_v62, 0.0  ;;  %v298_v7 = vmax.f32 %v282_v63, 0.0  ;;  %549 = vmatpush.msk.msra.mxu3 %vm373_vm0, %v347_v1  ;;  %547 = vmatpush.msk.msra.mxu1 %vm373_vm0, %v347_v1 }
  0x27   : > { %v304_v2 = vadd.f32 %v294_v61, %v293_v59  ;;  %v300_v8 = vadd.f32 %v286_v4, %v285_v3  ;;  %v302_v9 = vadd.f32 %v290_v5, %v289_v0 }
  0x28   : > { %v306_v10 = vadd.f32 %v298_v7, %v297_v6 }
  0x29   : > { %327 = vrot.lane.b32.xlu0 %v305_v52, %s690_s12  ;;  %325 = vrot.lane.b32.xlu2 %v304_v2, %s690_s12 }
  0x2a   : > { %319 = vrot.lane.b32.xlu1 %v301_v56, %s690_s12 }
  0x31   : > { %317 = vrot.lane.b32.xlu0 %v300_v8, %s690_s12  ;;  %329 = vrot.lane.b32.xlu2 %v306_v10, %s690_s12 }
  0x32   : > { %321 = vrot.lane.b32.xlu1 %v302_v9, %s690_s12  ;;  %s630_s12 = scalar_lea.hbm %s880_s4, 128 }
  0x33   : > { %p632_p2 = scmp.lt.s32.totalorder %s630_s12, %s626_s9 }
  0x35   : > { %p633_p3 = por %p632_p2, %p631_p1 }
  0x37   : > { %p634_p5 = pnand %p633_p3, %p629_p0 }
  0x83   : > { %v326_v15 = vpop.permute.xlu2 %325 }
  0x84   : > { %v344_v16 = vadd.f32 %v326_v15, %v304_v2 }
  0x8b   : > { %v330_v21 = vpop.permute.xlu2 %329 }
  0x8c   : > { %v346_v22 = vadd.f32 %v330_v21, %v306_v10 }
  0x93   : > { %v324_v11 = vpop.permute.xlu0 %323 }
  0x94   : > { %v343_v12 = vadd.f32 %v324_v11, %v303_v34  ;;  %v316_v13 = vpop.permute.xlu1 %315 }
  0x95   : > { %v339_v14 = vadd.f32 %v316_v13, %v299_v39 }
  0x96   : > { %536 = vmatmul.msk.f32.vlgmr.msra.gmra.mxu2 %vm348_vm1, %v343_v12 }
  0x97   : > { %532 = vmatmul.msk.f32.vlgmr.msra.gmra.mxu0 %vm348_vm1, %v339_v14 }
  0x9b   : > { %v328_v17 = vpop.permute.xlu0 %327 }
  0x9c   : > { %v345_v18 = vadd.f32 %v328_v17, %v305_v52  ;;  %v320_v19 = vpop.permute.xlu1 %319 }
  0x9d   : > { %v341_v20 = vadd.f32 %v320_v19, %v301_v56 }
  0x9e   : > { %537 = vmatmul.msk.f32.gmra.mxu2 %vm348_vm1, %v344_v16  ;;  %538 = vmatmul.msk.f32.vlgmr.msra.gmra.mxu3 %vm348_vm1, %v345_v18 }
  0x9f   : > { %534 = vmatmul.msk.f32.vlgmr.msra.gmra.mxu1 %vm348_vm1, %v341_v20 }
  0xa3   : > { %v318_v23 = vpop.permute.xlu0 %317 }
  0xa4   : > { %v340_v24 = vadd.f32 %v318_v23, %v300_v8  ;;  %v322_v25 = vpop.permute.xlu1 %321 }
  0xa5   : > { %v342_v26 = vadd.f32 %v322_v25, %v302_v9 }
  0xa6   : > { %539 = vmatmul.msk.f32.gmra.mxu3 %vm348_vm1, %v346_v22  ;;  %533 = vmatmul.msk.f32.gmra.mxu0 %vm348_vm1, %v340_v24 }
  0xa7   : > { %535 = vmatmul.msk.f32.gmra.mxu1 %vm348_vm1, %v342_v26 }
 0x114   : > { %v394_v27 = vpop.f32.mrf.mxu0 }
 0x115   : > { %418 = vst [vmem:[%s215_s24] sm:$0xff] %v394_v27 }
 0x119   : > { %v406_v28 = vpop.f32.mrf.mxu2 }
 0x11a   : > { %422 = vst [vmem:[%s215_s24 + $0x20] sm:$0xff] %v406_v28 }
 0x11c   : > { %v400_v29 = vpop.f32.mrf.mxu1 }
 0x11d   : > { %420 = vst [vmem:[%s215_s24 + $0x10] sm:$0xff] %v400_v29 }
 0x121   : > { %v409_v30 = vpop.f32.mrf.mxu2  ;;  %v412_v31 = vpop.f32.mrf.mxu3 }
 0x122   : > { %423 = vst [vmem:[%s215_s24 + $0x28] sm:$0xff] %v409_v30 }
 0x123   : > { %424 = vst [vmem:[%s215_s24 + $0x30] sm:$0xff] %v412_v31  ;;  %v397_v32 = vpop.f32.mrf.mxu0 }
 0x124   : > { %419 = vst [vmem:[%s215_s24 + $0x8] sm:$0xff] %v397_v32  ;;  %v403_v33 = vpop.f32.mrf.mxu1 }
 0x125   : > { %421 = vst [vmem:[%s215_s24 + $0x18] sm:$0xff] %v403_v33 }
 0x129   : > { %v415_v34 = vpop.f32.mrf.mxu3 }
 0x12a   : > { %425 = vst [vmem:[%s215_s24 + $0x38] sm:$0xff] %v415_v34 }
 0x12b   : > { %637 = shalt.err (!%p634_p5)
}
 0x12c   : > { %s691_s21 = smov 128   ;;  %s692_s22 = smov 8  }
 0x12d   : > { %550 = dma.vmem_to_hbm [thread:$0]  (%p758_p4), %s442_s6, 1024, %s444_s7, %s427_s18, %s691_s21, %s691_s21, %s692_s22  }
 0x12e PF: > { %p556_p6 = scmp.ge.s32.totalorder %s688_s20, 2  ;;  %s458_s24 = sand.u32 1, %s668_s15  }
 0x12f   : > { %s459_s26 = scalar_lea.sflag [#allocation3], %s458_s24 }
 0x130   : > { %p553_p7 = pnand %p556_p6, %p765_p8 }
 0x132   : > { %p554_p9 = pneg %p553_p7 }
 0x134   : > { %663 = dma.done.wait (%p554_p9), %s459_s26, 1024  }
 0x135   : > { %665 = vsyncadd (%p554_p9), %s459_s26, 4294966272  ;;  %s17_s20 = sadd.s32 1, %s688_s20   ;;  %s883_s15 = smov %s672_s16 }
 0x136   : > { %p14_p10 = scmp.ge.s32.totalorder %s17_s20, 4   ;;  %s884_s16 = smov %s676_s17 }
 0x137   : > { %s885_s17 = smov %s771_s28  ;;  %s886_s18 = smov %s684_s19 }
 0x138   : > { %s887_s19 = smov %s889_s23  ;;  %16 = sbr.rel (!%p14_p10) target bundleno = 4 (0x4), region = 71 }
 0x13d   :  { %465 = vsyncpa [#allocation3], 1 }
 0x13e   :  { %467 = vsyncpa [#allocation3 + $0x1], 1 }

</bundles_post_ra>
